<compile_context>
chip_gen: v5e
topology: v5e:2x2
jax: 0.10.0
libtpu: 0.0.40
codegen_flags: <defaults>
</compile_context>

<pallas_src>
import functools

import jax
import jax.numpy as jnp
import numpy as np
from jax.experimental import pallas as pl
from jax.experimental.pallas import tpu as pltpu


def _transformer_layer_kernel(num_heads,
                              x_ref, wqkv_ref, bqkv_ref,
                              wo_ref, bo_ref, w12_ref,
                              o_ref):
    f32 = jnp.float32
    bf16 = jnp.bfloat16

    B, L, C = x_ref.shape
    d = C // num_heads

    x_bf = x_ref[...].reshape(B * L, C)              # (B*L, C) bf16 MXU input
    x_f = x_bf.astype(f32)                           # f32 residual path

    # Single fused q/k/v projection (one MXU push, one bias add, 3C-wide slab).
    qkv = jnp.dot(x_bf, wqkv_ref[...],
                  preferred_element_type=f32) + bqkv_ref[...]   # (B*L, 3C) f32
    qkv_b = qkv.reshape(B, L, 3 * C).astype(bf16)

    wo = wo_ref[...]                                 # (C, C) bf16, loaded once

    # Out-projection accumulation: start from out-proj bias + residual; each
    # head adds its (B*L, d) @ (d, C) contribution.  No attn scratch slab,
    # no masked width-d stores, no concatenate.
    x1 = x_f + bo_ref[...]                           # (B*L, C) f32

    # TODO(synk): replace the unrolled per-head loop with a (B*H)-batched
    # dot_general + flash-style K-blocked softmax for large L / num_heads.
    for h in range(num_heads):
        lo = h * d
        qh = qkv_b[:, :, lo:lo + d]                  # (B, L, d); 1/sqrt(d) pre-folded
        kh = qkv_b[:, :, C + lo:C + lo + d]
        vh = qkv_b[:, :, 2 * C + lo:2 * C + lo + d]

        s = jnp.einsum('bqd,bkd->bqk', qh, kh,
                       preferred_element_type=f32)   # (B, L, L) f32
        s = s - jnp.max(s, axis=-1, keepdims=True)
        p = jnp.exp(s)
        denom = jnp.sum(p, axis=-1, keepdims=True)   # (B, L, 1) f32
        oh = jnp.einsum('bqk,bkd->bqd', p.astype(bf16), vh,
                        preferred_element_type=f32)  # (B, L, d) f32
        # Deferred softmax normalization: one (B, L, d) scale via the EUP slot.
        oh = (oh * pl.reciprocal(denom, approx=True)).reshape(B * L, d)
        x1 = x1 + jnp.dot(oh.astype(bf16), wo[lo:lo + d, :],
                          preferred_element_type=f32)

    # Fused fc2(fc1(.)) + residual (single folded W12 matmul, f32 add).
    x2 = jnp.dot(x1.astype(bf16), w12_ref[...], preferred_element_type=f32) + x1

    o_ref[...] = x2.reshape(B, L, C).astype(o_ref.dtype)


def _fuse_params(params, num_heads, c):
    """Fold outer q/k/v into MHA in-proj, concat to one (C,3C) QKV, fold fc1@fc2."""
    (wq_t, wk_t, wv_t, wqi_t, wki_t, wvi_t,
     bqi, bki, bvi, wo_t, bo, w1_t, w2_t) = params
    d = c // num_heads
    scale = 1.0 / float(np.sqrt(d))
    bf16, f32 = jnp.bfloat16, jnp.float32

    wq_f = (wq_t @ wqi_t) * scale                    # scale folded into q path
    wk_f = wk_t @ wki_t
    wv_f = wv_t @ wvi_t
    w_qkv = jnp.concatenate([wq_f, wk_f, wv_f], axis=1).astype(bf16)     # (C, 3C)
    b_qkv = jnp.concatenate([bqi * scale, bki, bvi], axis=1).astype(f32)  # (1, 3C)
    # Valid only because there is NO activation/bias between fc1 and fc2.
    w12 = (w1_t @ w2_t).astype(bf16)
    return (w_qkv, b_qkv, wo_t.astype(bf16), bo.astype(f32), w12)


def _pick_batch_tile(n, l, target_rows=512, min_steps=2):
    """Largest divisor of n with <= ~target_rows rows per step, but keeping the
    grid at least min_steps long (v7x megacore + DMA pipelining)."""
    best = 1
    for cand in range(1, n + 1):
        if n % cand:
            continue
        if cand * l > max(target_rows, l):
            continue
        if (n // cand) < min_steps and n >= min_steps:
            continue
        best = max(best, cand)
    return best


def _vmem_limit_bytes():
    """Generation-aware scoped-VMEM budget: 3/4 of physical, clamped to [32, 96] MiB."""
    mib = 1024 * 1024
    try:
        cap = int(pltpu.get_tpu_info().vmem_capacity_bytes)
    except Exception:  # fall back to a budget that is safe on v5e/v6e/v7x
        cap = None
    if not cap:
        return 64 * mib
    return max(min((cap * 3) // 4, 96 * mib), 32 * mib)


def _cost_estimate(n, l, c, h):
    """Advisory hint for XLA scheduling of the custom call."""
    d = c // h
    flops = (2 * n * l * c * (3 * c)        # fused QKV projection
             + 4 * n * h * l * l * d        # scores + PV
             + 2 * n * l * c * c            # out-projection
             + 2 * n * l * c * c)           # fused fc1@fc2
    transcendentals = n * h * l * l         # exp (approx reciprocal is EUP-cheap)
    bytes_accessed = (n * l * c * (2 + 4)   # bf16 input + f32 output
                      + 5 * c * c * 2       # bf16 weights (3C + C + C columns)
                      + 4 * c * 4)          # f32 biases
    return pl.CostEstimate(flops=int(flops),
                           transcendentals=int(transcendentals),
                           bytes_accessed=int(bytes_accessed))


def transformer_layer_pallas(x_lnc, params, num_heads):
    """x_lnc: (L, N, C) as in PyTorch; params are raw (unfused); returns (L, N, C)."""
    L, N, C = x_lnc.shape
    assert C % num_heads == 0
    fused = _fuse_params(params, num_heads, C)

    # bf16 activations on the wire (halves input DMA); f32 restored in-kernel.
    x_nlc = jnp.transpose(x_lnc, (1, 0, 2)).astype(jnp.bfloat16)   # (N, L, C)

    b_tile = _pick_batch_tile(N, L)
    grid = (N // b_tile,)

    kernel = functools.partial(_transformer_layer_kernel, num_heads)
    x_spec = pl.BlockSpec((b_tile, L, C), lambda n: (n, 0, 0))
    # Weights/biases are grid-invariant (constant index_map).  They are tiny
    # (5*C*C bf16) at these shapes so default double-buffering is harmless.
    # TODO(synk): pipeline_mode=pl.Buffered(1) on these specs once large-C
    # configs make double-buffered resident weights a v7x (64 MiB) concern.
    wqkv_spec = pl.BlockSpec((C, 3 * C), lambda n: (0, 0))
    bqkv_spec = pl.BlockSpec((1, 3 * C), lambda n: (0, 0))
    w_spec = pl.BlockSpec((C, C), lambda n: (0, 0))
    b_spec = pl.BlockSpec((1, C), lambda n: (0, 0))

    out = pl.pallas_call(
        kernel,
        out_shape=jax.ShapeDtypeStruct((N, L, C), jnp.float32),
        grid_spec=pltpu.PrefetchScalarGridSpec(
            num_scalar_prefetch=0,
            grid=grid,
            in_specs=[x_spec,
                      wqkv_spec, bqkv_spec,          # fused QKV weight + bias
                      w_spec, b_spec,                # out-proj weight, bias
                      w_spec],                       # fused fc1 @ fc2
            out_specs=x_spec),
        compiler_params=pltpu.CompilerParams(
            dimension_semantics=("parallel",),
            vmem_limit_bytes=_vmem_limit_bytes()),
        cost_estimate=_cost_estimate(N, L, C, num_heads),
    )(x_nlc, *fused)

    return jnp.transpose(out, (1, 0, 2))             # back to (L, N, C)


def make_params(key, c):
    """Deterministic synthetic parameters (PyTorch Linear convention y = x @ W.T).

    Tensors are pre-transposed so the math is x @ W directly.
    """
    ks = jax.random.split(key, 11)

    def w(k):
        W = jax.random.normal(k, (c, c), jnp.float32) * (1.0 / np.sqrt(c))
        return W.T

    def b(k):
        return jax.random.normal(k, (1, c), jnp.float32) * 0.02

    wq_t, wk_t, wv_t = w(ks[0]), w(ks[1]), w(ks[2])
    wqi_t, wki_t, wvi_t = w(ks[3]), w(ks[4]), w(ks[5])
    bqi, bki, bvi = b(ks[6]), b(ks[7]), b(ks[8])
    wo_t, bo = w(ks[9]), b(ks[10])
    w1_t = w(jax.random.fold_in(key, 100))
    w2_t = w(jax.random.fold_in(key, 101))
    return (wq_t, wk_t, wv_t, wqi_t, wki_t, wvi_t,
            bqi, bki, bvi, wo_t, bo, w1_t, w2_t)


def transformer_layer_ref(x_lnc, params, num_heads):
    """Pure-JAX f32 reference of the unfused PyTorch math (correctness check)."""
    (wq_t, wk_t, wv_t, wqi_t, wki_t, wvi_t,
     bqi, bki, bvi, wo_t, bo, w1_t, w2_t) = params
    L, N, C = x_lnc.shape
    d = C // num_heads
    x = jnp.transpose(x_lnc, (1, 0, 2))              # (N, L, C)

    q = x @ wq_t
    k = x @ wk_t
    v = x @ wv_t
    qi = q @ wqi_t + bqi[0]
    ki = k @ wki_t + bki[0]
    vi = v @ wvi_t + bvi[0]

    def split(t):
        return t.reshape(N, L, num_heads, d)

    qh, kh, vh = split(qi), split(ki), split(vi)
    s = jnp.einsum("nlhd,nmhd->nhlm", qh, kh) / np.sqrt(d)
    p = jax.nn.softmax(s, axis=-1)
    o = jnp.einsum("nhlm,nmhd->nlhd", p, vh).reshape(N, L, C)

    x1 = o @ wo_t + bo[0] + x
    x2 = (x1 @ w1_t) @ w2_t + x1
    return jnp.transpose(x2, (1, 0, 2))              # (L, N, C)


if __name__ == "__main__":
    L, N, C, H = 8, 2, 32, 4                         # seq, batch, channels, heads
    key = jax.random.PRNGKey(0)
    kx, kp = jax.random.split(key)
    x = jax.random.normal(kx, (L, N, C), jnp.float32)
    params = make_params(kp, C)

    out = jax.block_until_ready(transformer_layer_pallas(x, params, H))
    ref = jax.block_until_ready(transformer_layer_ref(x, params, H))

    # bf16 activations/weights on the MXU + approx reciprocal loosen the
    # tolerance vs. the pure-f32 reference; 5e-2 is well above the expected
    # ~1e-2 rounding error and well below algorithmic-mistake-sized error.
    np.testing.assert_allclose(np.asarray(out), np.asarray(ref),
                               rtol=5e-2, atol=5e-2)
    print("KERNEL_OK")
</pallas_src>

<mosaic_0001>
module attributes {stable_mosaic.version = 11 : i64} {
  func.func @_transformer_layer_kernel(%arg0: i32, %arg1: memref<1x8x32xbf16, #tpu.memory_space<vmem>>, %arg2: memref<32x96xbf16, #tpu.memory_space<vmem>>, %arg3: memref<1x96xf32, #tpu.memory_space<vmem>>, %arg4: memref<32x32xbf16, #tpu.memory_space<vmem>>, %arg5: memref<1x32xf32, #tpu.memory_space<vmem>>, %arg6: memref<32x32xbf16, #tpu.memory_space<vmem>>, %arg7: memref<1x8x32xf32, #tpu.memory_space<vmem>>) attributes {dimension_semantics = [#tpu.dimension_semantics<parallel>], iteration_bounds = array<i64: 2>, scalar_prefetch = 0 : i64, scratch_operands = 0 : i64, tpu.core_type = #tpu.core_type<tc>, window_params = [{transform_indices = @transform_0, window_bounds = array<i64: 1, 8, 32>}, {pipeline_mode = #tpu.pipeline_mode<synchronous>, transform_indices = @transform_1, window_bounds = array<i64: 32, 96>}, {pipeline_mode = #tpu.pipeline_mode<synchronous>, transform_indices = @transform_2, window_bounds = array<i64: 1, 96>}, {pipeline_mode = #tpu.pipeline_mode<synchronous>, transform_indices = @transform_3, window_bounds = array<i64: 32, 32>}, {pipeline_mode = #tpu.pipeline_mode<synchronous>, transform_indices = @transform_4, window_bounds = array<i64: 1, 32>}, {pipeline_mode = #tpu.pipeline_mode<synchronous>, transform_indices = @transform_5, window_bounds = array<i64: 32, 32>}, {transform_indices = @transform_6, window_bounds = array<i64: 1, 8, 32>}]} {
    %c0 = arith.constant 0 : index
    %c0_0 = arith.constant 0 : index
    %c0_1 = arith.constant 0 : index
    %0 = vector.load %arg1[%c0, %c0_0, %c0_1] : memref<1x8x32xbf16, #tpu.memory_space<vmem>>, vector<1x8x32xbf16>
    %1 = vector.shape_cast %0 : vector<1x8x32xbf16> to vector<8x32xbf16>
    %2 = arith.extf %1 : vector<8x32xbf16> to vector<8x32xf32>
    %c0_2 = arith.constant 0 : index
    %c0_3 = arith.constant 0 : index
    %3 = vector.load %arg2[%c0_2, %c0_3] : memref<32x96xbf16, #tpu.memory_space<vmem>>, vector<32x96xbf16>
    %cst = arith.constant dense<0.000000e+00> : vector<8x96xf32>
    %4 = tpu.matmul %1, %3, %cst {dimension_numbers = #tpu.dot_dimension_numbers<[1], [0], [0], [1], [0, 0, 1, 1], [], []>} : vector<8x32xbf16>, vector<32x96xbf16>, vector<8x96xf32> -> vector<8x96xf32>
    %c0_4 = arith.constant 0 : index
    %c0_5 = arith.constant 0 : index
    %5 = vector.load %arg3[%c0_4, %c0_5] : memref<1x96xf32, #tpu.memory_space<vmem>>, vector<1x96xf32>
    %6 = vector.broadcast %5 : vector<1x96xf32> to vector<8x96xf32>
    %7 = arith.addf %4, %6 : vector<8x96xf32>
    %8 = vector.shape_cast %7 : vector<8x96xf32> to vector<1x8x96xf32>
    %9 = arith.truncf %8 : vector<1x8x96xf32> to vector<1x8x96xbf16>
    %c0_6 = arith.constant 0 : index
    %c0_7 = arith.constant 0 : index
    %10 = vector.load %arg4[%c0_6, %c0_7] : memref<32x32xbf16, #tpu.memory_space<vmem>>, vector<32x32xbf16>
    %c0_8 = arith.constant 0 : index
    %c0_9 = arith.constant 0 : index
    %11 = vector.load %arg5[%c0_8, %c0_9] : memref<1x32xf32, #tpu.memory_space<vmem>>, vector<1x32xf32>
    %12 = vector.broadcast %11 : vector<1x32xf32> to vector<8x32xf32>
    %13 = arith.addf %2, %12 : vector<8x32xf32>
    %14 = vector.extract_strided_slice %9 {offsets = [0, 0, 0], sizes = [1, 8, 8], strides = [1, 1, 1]} : vector<1x8x96xbf16> to vector<1x8x8xbf16>
    %15 = vector.extract_strided_slice %9 {offsets = [0, 0, 32], sizes = [1, 8, 8], strides = [1, 1, 1]} : vector<1x8x96xbf16> to vector<1x8x8xbf16>
    %16 = vector.extract_strided_slice %9 {offsets = [0, 0, 64], sizes = [1, 8, 8], strides = [1, 1, 1]} : vector<1x8x96xbf16> to vector<1x8x8xbf16>
    "tpu.trace_start"() <{level = 10 : i32, message = "bqd,bkd->bqk"}> : () -> ()
    %cst_10 = arith.constant dense<0.000000e+00> : vector<1x8x8xf32>
    %17 = tpu.matmul %14, %15, %cst_10 {dimension_numbers = #tpu.dot_dimension_numbers<[2], [2], [1], [1], [0, 0, 0, 1, 1, 1], [0], [0]>} : vector<1x8x8xbf16>, vector<1x8x8xbf16>, vector<1x8x8xf32> -> vector<1x8x8xf32>
    "tpu.trace_stop"() : () -> ()
    %cst_11 = arith.constant dense<0xFF800000> : vector<1x8xf32>
    %18 = vector.multi_reduction <maximumf>, %17, %cst_11 [2] : vector<1x8x8xf32> to vector<1x8xf32>
    %19 = vector.shape_cast %18 : vector<1x8xf32> to vector<1x8x1xf32>
    %20 = vector.broadcast %19 : vector<1x8x1xf32> to vector<1x8x8xf32>
    %21 = arith.subf %17, %20 : vector<1x8x8xf32>
    %22 = math.exp %21 : vector<1x8x8xf32>
    %cst_12 = arith.constant dense<0.000000e+00> : vector<1x8xf32>
    %23 = vector.multi_reduction <add>, %22, %cst_12 [2] : vector<1x8x8xf32> to vector<1x8xf32>
    %24 = vector.shape_cast %23 : vector<1x8xf32> to vector<1x8x1xf32>
    %25 = arith.truncf %22 : vector<1x8x8xf32> to vector<1x8x8xbf16>
    "tpu.trace_start"() <{level = 10 : i32, message = "bqk,bkd->bqd"}> : () -> ()
    %cst_13 = arith.constant dense<0.000000e+00> : vector<1x8x8xf32>
    %26 = tpu.matmul %25, %16, %cst_13 {dimension_numbers = #tpu.dot_dimension_numbers<[2], [1], [1], [2], [0, 0, 0, 1, 1, 2], [0], [0]>} : vector<1x8x8xbf16>, vector<1x8x8xbf16>, vector<1x8x8xf32> -> vector<1x8x8xf32>
    "tpu.trace_stop"() : () -> ()
    %27 = tpu.reciprocal %24 {approx = true} : vector<1x8x1xf32> -> vector<1x8x1xf32>
    %28 = vector.broadcast %27 : vector<1x8x1xf32> to vector<1x8x8xf32>
    %29 = arith.mulf %26, %28 : vector<1x8x8xf32>
    %30 = vector.shape_cast %29 : vector<1x8x8xf32> to vector<8x8xf32>
    %31 = arith.truncf %30 : vector<8x8xf32> to vector<8x8xbf16>
    %32 = vector.extract_strided_slice %10 {offsets = [0, 0], sizes = [8, 32], strides = [1, 1]} : vector<32x32xbf16> to vector<8x32xbf16>
    %cst_14 = arith.constant dense<0.000000e+00> : vector<8x32xf32>
    %33 = tpu.matmul %31, %32, %cst_14 {dimension_numbers = #tpu.dot_dimension_numbers<[1], [0], [0], [1], [0, 0, 1, 1], [], []>} : vector<8x8xbf16>, vector<8x32xbf16>, vector<8x32xf32> -> vector<8x32xf32>
    %34 = arith.addf %13, %33 : vector<8x32xf32>
    %35 = vector.extract_strided_slice %9 {offsets = [0, 0, 8], sizes = [1, 8, 8], strides = [1, 1, 1]} : vector<1x8x96xbf16> to vector<1x8x8xbf16>
    %36 = vector.extract_strided_slice %9 {offsets = [0, 0, 40], sizes = [1, 8, 8], strides = [1, 1, 1]} : vector<1x8x96xbf16> to vector<1x8x8xbf16>
    %37 = vector.extract_strided_slice %9 {offsets = [0, 0, 72], sizes = [1, 8, 8], strides = [1, 1, 1]} : vector<1x8x96xbf16> to vector<1x8x8xbf16>
    "tpu.trace_start"() <{level = 10 : i32, message = "bqd,bkd->bqk"}> : () -> ()
    %cst_15 = arith.constant dense<0.000000e+00> : vector<1x8x8xf32>
    %38 = tpu.matmul %35, %36, %cst_15 {dimension_numbers = #tpu.dot_dimension_numbers<[2], [2], [1], [1], [0, 0, 0, 1, 1, 1], [0], [0]>} : vector<1x8x8xbf16>, vector<1x8x8xbf16>, vector<1x8x8xf32> -> vector<1x8x8xf32>
    "tpu.trace_stop"() : () -> ()
    %cst_16 = arith.constant dense<0xFF800000> : vector<1x8xf32>
    %39 = vector.multi_reduction <maximumf>, %38, %cst_16 [2] : vector<1x8x8xf32> to vector<1x8xf32>
    %40 = vector.shape_cast %39 : vector<1x8xf32> to vector<1x8x1xf32>
    %41 = vector.broadcast %40 : vector<1x8x1xf32> to vector<1x8x8xf32>
    %42 = arith.subf %38, %41 : vector<1x8x8xf32>
    %43 = math.exp %42 : vector<1x8x8xf32>
    %cst_17 = arith.constant dense<0.000000e+00> : vector<1x8xf32>
    %44 = vector.multi_reduction <add>, %43, %cst_17 [2] : vector<1x8x8xf32> to vector<1x8xf32>
    %45 = vector.shape_cast %44 : vector<1x8xf32> to vector<1x8x1xf32>
    %46 = arith.truncf %43 : vector<1x8x8xf32> to vector<1x8x8xbf16>
    "tpu.trace_start"() <{level = 10 : i32, message = "bqk,bkd->bqd"}> : () -> ()
    %cst_18 = arith.constant dense<0.000000e+00> : vector<1x8x8xf32>
    %47 = tpu.matmul %46, %37, %cst_18 {dimension_numbers = #tpu.dot_dimension_numbers<[2], [1], [1], [2], [0, 0, 0, 1, 1, 2], [0], [0]>} : vector<1x8x8xbf16>, vector<1x8x8xbf16>, vector<1x8x8xf32> -> vector<1x8x8xf32>
    "tpu.trace_stop"() : () -> ()
    %48 = tpu.reciprocal %45 {approx = true} : vector<1x8x1xf32> -> vector<1x8x1xf32>
    %49 = vector.broadcast %48 : vector<1x8x1xf32> to vector<1x8x8xf32>
    %50 = arith.mulf %47, %49 : vector<1x8x8xf32>
    %51 = vector.shape_cast %50 : vector<1x8x8xf32> to vector<8x8xf32>
    %52 = arith.truncf %51 : vector<8x8xf32> to vector<8x8xbf16>
    %53 = vector.extract_strided_slice %10 {offsets = [8, 0], sizes = [8, 32], strides = [1, 1]} : vector<32x32xbf16> to vector<8x32xbf16>
    %cst_19 = arith.constant dense<0.000000e+00> : vector<8x32xf32>
    %54 = tpu.matmul %52, %53, %cst_19 {dimension_numbers = #tpu.dot_dimension_numbers<[1], [0], [0], [1], [0, 0, 1, 1], [], []>} : vector<8x8xbf16>, vector<8x32xbf16>, vector<8x32xf32> -> vector<8x32xf32>
    %55 = arith.addf %34, %54 : vector<8x32xf32>
    %56 = vector.extract_strided_slice %9 {offsets = [0, 0, 16], sizes = [1, 8, 8], strides = [1, 1, 1]} : vector<1x8x96xbf16> to vector<1x8x8xbf16>
    %57 = vector.extract_strided_slice %9 {offsets = [0, 0, 48], sizes = [1, 8, 8], strides = [1, 1, 1]} : vector<1x8x96xbf16> to vector<1x8x8xbf16>
    %58 = vector.extract_strided_slice %9 {offsets = [0, 0, 80], sizes = [1, 8, 8], strides = [1, 1, 1]} : vector<1x8x96xbf16> to vector<1x8x8xbf16>
    "tpu.trace_start"() <{level = 10 : i32, message = "bqd,bkd->bqk"}> : () -> ()
    %cst_20 = arith.constant dense<0.000000e+00> : vector<1x8x8xf32>
    %59 = tpu.matmul %56, %57, %cst_20 {dimension_numbers = #tpu.dot_dimension_numbers<[2], [2], [1], [1], [0, 0, 0, 1, 1, 1], [0], [0]>} : vector<1x8x8xbf16>, vector<1x8x8xbf16>, vector<1x8x8xf32> -> vector<1x8x8xf32>
    "tpu.trace_stop"() : () -> ()
    %cst_21 = arith.constant dense<0xFF800000> : vector<1x8xf32>
    %60 = vector.multi_reduction <maximumf>, %59, %cst_21 [2] : vector<1x8x8xf32> to vector<1x8xf32>
    %61 = vector.shape_cast %60 : vector<1x8xf32> to vector<1x8x1xf32>
    %62 = vector.broadcast %61 : vector<1x8x1xf32> to vector<1x8x8xf32>
    %63 = arith.subf %59, %62 : vector<1x8x8xf32>
    %64 = math.exp %63 : vector<1x8x8xf32>
    %cst_22 = arith.constant dense<0.000000e+00> : vector<1x8xf32>
    %65 = vector.multi_reduction <add>, %64, %cst_22 [2] : vector<1x8x8xf32> to vector<1x8xf32>
    %66 = vector.shape_cast %65 : vector<1x8xf32> to vector<1x8x1xf32>
    %67 = arith.truncf %64 : vector<1x8x8xf32> to vector<1x8x8xbf16>
    "tpu.trace_start"() <{level = 10 : i32, message = "bqk,bkd->bqd"}> : () -> ()
    %cst_23 = arith.constant dense<0.000000e+00> : vector<1x8x8xf32>
    %68 = tpu.matmul %67, %58, %cst_23 {dimension_numbers = #tpu.dot_dimension_numbers<[2], [1], [1], [2], [0, 0, 0, 1, 1, 2], [0], [0]>} : vector<1x8x8xbf16>, vector<1x8x8xbf16>, vector<1x8x8xf32> -> vector<1x8x8xf32>
    "tpu.trace_stop"() : () -> ()
    %69 = tpu.reciprocal %66 {approx = true} : vector<1x8x1xf32> -> vector<1x8x1xf32>
    %70 = vector.broadcast %69 : vector<1x8x1xf32> to vector<1x8x8xf32>
    %71 = arith.mulf %68, %70 : vector<1x8x8xf32>
    %72 = vector.shape_cast %71 : vector<1x8x8xf32> to vector<8x8xf32>
    %73 = arith.truncf %72 : vector<8x8xf32> to vector<8x8xbf16>
    %74 = vector.extract_strided_slice %10 {offsets = [16, 0], sizes = [8, 32], strides = [1, 1]} : vector<32x32xbf16> to vector<8x32xbf16>
    %cst_24 = arith.constant dense<0.000000e+00> : vector<8x32xf32>
    %75 = tpu.matmul %73, %74, %cst_24 {dimension_numbers = #tpu.dot_dimension_numbers<[1], [0], [0], [1], [0, 0, 1, 1], [], []>} : vector<8x8xbf16>, vector<8x32xbf16>, vector<8x32xf32> -> vector<8x32xf32>
    %76 = arith.addf %55, %75 : vector<8x32xf32>
    %77 = vector.extract_strided_slice %9 {offsets = [0, 0, 24], sizes = [1, 8, 8], strides = [1, 1, 1]} : vector<1x8x96xbf16> to vector<1x8x8xbf16>
    %78 = vector.extract_strided_slice %9 {offsets = [0, 0, 56], sizes = [1, 8, 8], strides = [1, 1, 1]} : vector<1x8x96xbf16> to vector<1x8x8xbf16>
    %79 = vector.extract_strided_slice %9 {offsets = [0, 0, 88], sizes = [1, 8, 8], strides = [1, 1, 1]} : vector<1x8x96xbf16> to vector<1x8x8xbf16>
    "tpu.trace_start"() <{level = 10 : i32, message = "bqd,bkd->bqk"}> : () -> ()
    %cst_25 = arith.constant dense<0.000000e+00> : vector<1x8x8xf32>
    %80 = tpu.matmul %77, %78, %cst_25 {dimension_numbers = #tpu.dot_dimension_numbers<[2], [2], [1], [1], [0, 0, 0, 1, 1, 1], [0], [0]>} : vector<1x8x8xbf16>, vector<1x8x8xbf16>, vector<1x8x8xf32> -> vector<1x8x8xf32>
    "tpu.trace_stop"() : () -> ()
    %cst_26 = arith.constant dense<0xFF800000> : vector<1x8xf32>
    %81 = vector.multi_reduction <maximumf>, %80, %cst_26 [2] : vector<1x8x8xf32> to vector<1x8xf32>
    %82 = vector.shape_cast %81 : vector<1x8xf32> to vector<1x8x1xf32>
    %83 = vector.broadcast %82 : vector<1x8x1xf32> to vector<1x8x8xf32>
    %84 = arith.subf %80, %83 : vector<1x8x8xf32>
    %85 = math.exp %84 : vector<1x8x8xf32>
    %cst_27 = arith.constant dense<0.000000e+00> : vector<1x8xf32>
    %86 = vector.multi_reduction <add>, %85, %cst_27 [2] : vector<1x8x8xf32> to vector<1x8xf32>
    %87 = vector.shape_cast %86 : vector<1x8xf32> to vector<1x8x1xf32>
    %88 = arith.truncf %85 : vector<1x8x8xf32> to vector<1x8x8xbf16>
    "tpu.trace_start"() <{level = 10 : i32, message = "bqk,bkd->bqd"}> : () -> ()
    %cst_28 = arith.constant dense<0.000000e+00> : vector<1x8x8xf32>
    %89 = tpu.matmul %88, %79, %cst_28 {dimension_numbers = #tpu.dot_dimension_numbers<[2], [1], [1], [2], [0, 0, 0, 1, 1, 2], [0], [0]>} : vector<1x8x8xbf16>, vector<1x8x8xbf16>, vector<1x8x8xf32> -> vector<1x8x8xf32>
    "tpu.trace_stop"() : () -> ()
    %90 = tpu.reciprocal %87 {approx = true} : vector<1x8x1xf32> -> vector<1x8x1xf32>
    %91 = vector.broadcast %90 : vector<1x8x1xf32> to vector<1x8x8xf32>
    %92 = arith.mulf %89, %91 : vector<1x8x8xf32>
    %93 = vector.shape_cast %92 : vector<1x8x8xf32> to vector<8x8xf32>
    %94 = arith.truncf %93 : vector<8x8xf32> to vector<8x8xbf16>
    %95 = vector.extract_strided_slice %10 {offsets = [24, 0], sizes = [8, 32], strides = [1, 1]} : vector<32x32xbf16> to vector<8x32xbf16>
    %cst_29 = arith.constant dense<0.000000e+00> : vector<8x32xf32>
    %96 = tpu.matmul %94, %95, %cst_29 {dimension_numbers = #tpu.dot_dimension_numbers<[1], [0], [0], [1], [0, 0, 1, 1], [], []>} : vector<8x8xbf16>, vector<8x32xbf16>, vector<8x32xf32> -> vector<8x32xf32>
    %97 = arith.addf %76, %96 : vector<8x32xf32>
    %98 = arith.truncf %97 : vector<8x32xf32> to vector<8x32xbf16>
    %c0_30 = arith.constant 0 : index
    %c0_31 = arith.constant 0 : index
    %99 = vector.load %arg6[%c0_30, %c0_31] : memref<32x32xbf16, #tpu.memory_space<vmem>>, vector<32x32xbf16>
    %cst_32 = arith.constant dense<0.000000e+00> : vector<8x32xf32>
    %100 = tpu.matmul %98, %99, %cst_32 {dimension_numbers = #tpu.dot_dimension_numbers<[1], [0], [0], [1], [0, 0, 1, 1], [], []>} : vector<8x32xbf16>, vector<32x32xbf16>, vector<8x32xf32> -> vector<8x32xf32>
    %101 = arith.addf %100, %97 : vector<8x32xf32>
    %102 = vector.shape_cast %101 : vector<8x32xf32> to vector<1x8x32xf32>
    %c0_33 = arith.constant 0 : index
    %c0_34 = arith.constant 0 : index
    %c0_35 = arith.constant 0 : index
    %103 = vector.load %arg7[%c0_33, %c0_34, %c0_35] : memref<1x8x32xf32, #tpu.memory_space<vmem>>, vector<1x8x32xf32>
    tpu.vector_store %arg7[%c0_33, %c0_34, %c0_35], %102 {strides = array<i32>} : memref<1x8x32xf32, #tpu.memory_space<vmem>>, vector<1x8x32xf32>,
    return
  }
  func.func @transform_0(%arg0: i32) -> (i32, i32, i32) {
    %c0_i32 = arith.constant 0 : i32
    %c0_i32_0 = arith.constant 0 : i32
    %c0_i32_1 = arith.constant 0 : i32
    return %arg0, %c0_i32, %c0_i32_0 : i32, i32, i32
  }
  func.func @transform_1(%arg0: i32) -> (i32, i32) {
    %c0_i32 = arith.constant 0 : i32
    %c0_i32_0 = arith.constant 0 : i32
    %c0_i32_1 = arith.constant 0 : i32
    return %c0_i32, %c0_i32_0 : i32, i32
  }
  func.func @transform_2(%arg0: i32) -> (i32, i32) {
    %c0_i32 = arith.constant 0 : i32
    %c0_i32_0 = arith.constant 0 : i32
    %c0_i32_1 = arith.constant 0 : i32
    return %c0_i32, %c0_i32_0 : i32, i32
  }
  func.func @transform_3(%arg0: i32) -> (i32, i32) {
    %c0_i32 = arith.constant 0 : i32
    %c0_i32_0 = arith.constant 0 : i32
    %c0_i32_1 = arith.constant 0 : i32
    return %c0_i32, %c0_i32_0 : i32, i32
  }
  func.func @transform_4(%arg0: i32) -> (i32, i32) {
    %c0_i32 = arith.constant 0 : i32
    %c0_i32_0 = arith.constant 0 : i32
    %c0_i32_1 = arith.constant 0 : i32
    return %c0_i32, %c0_i32_0 : i32, i32
  }
  func.func @transform_5(%arg0: i32) -> (i32, i32) {
    %c0_i32 = arith.constant 0 : i32
    %c0_i32_0 = arith.constant 0 : i32
    %c0_i32_1 = arith.constant 0 : i32
    return %c0_i32, %c0_i32_0 : i32, i32
  }
  func.func @transform_6(%arg0: i32) -> (i32, i32, i32) {
    %c0_i32 = arith.constant 0 : i32
    %c0_i32_0 = arith.constant 0 : i32
    %c0_i32_1 = arith.constant 0 : i32
    return %arg0, %c0_i32, %c0_i32_0 : i32, i32, i32
  }
}

</mosaic_0001>

<bundles_post_ra>
// kernel: tpu_custom_call.1
= control target key start
LH: loop header
LB: loop body
LE: loop exit
PB: predicated region body
PF: predicated region fallthrough
CT: control target
= control target key end

     0   :  { %11 = vsyncpa [#allocation3], 0  ;;  %s1451_s0 = inlined_call_operand.hbm [shape: bf16[2,8,32], index: 0, kind: input, shape index: {}]   ;;  %s1452_s1 = inlined_call_operand.hbm [shape: bf16[32,96], index: 1, kind: input, shape index: {}]   ;;  %s1453_s2 = inlined_call_operand.vmem [shape: f32[1,96], index: 2, kind: input, shape index: {}]   ;;  %s1454_s3 = inlined_call_operand.hbm [shape: bf16[32,32], index: 3, kind: input, shape index: {}]   ;;  %s1455_s4 = inlined_call_operand.vmem [shape: f32[1,32], index: 4, kind: input, shape index: {}]   ;;  %s1456_s5 = inlined_call_operand.hbm [shape: bf16[32,32], index: 5, kind: input, shape index: {}]   ;;  %s1457_s6 = inlined_call_operand.hbm [shape: f32[2,8,32], index: 6, kind: output, shape index: {}]  }
   0x1   :  { %13 = vsyncpa [#allocation3 + $0x1], 0 }
   0x2   :  { %14 = vsyncpa [#allocation6], 0 }
   0x3   :  { %15 = vsyncpa [#allocation9], 0 }
   0x4   :  { %16 = vsyncpa [#allocation4], 0 }
   0x5   :  { %18 = vsyncpa [#allocation4 + $0x1], 0  ;;  %s1236_s21 = smov 0   ;;  %s1238_s22 = smov 0  }
   0x6   :  { %s1240_s23 = smov 0   ;;  %s1242_s24 = smov 0  }
   0x7 LB: > { %s197_s27 = sshll.u32 %s1452_s1, 4  ;;  %s1260_s28 = sadd.s32 4294967295, %s1183_s24   ;;  %s1183_s24 = sphi %s1242_s24, %s1468_s24   ;;  %s1179_s23 = sphi %s1240_s23, %s1467_s23   ;;  %s1175_s22 = sphi %s1238_s22, %s1466_s22   ;;  %s1171_s21 = sphi %s1236_s21, %s1465_s21   ;;  %s198_s27 = int_to_ptr.hbm [resolvable:$true] %s197_s27 }
   0x8   : > { %p830_p0 = scmp.ge.s32.totalorder %s1183_s24, 1  ;;  %p45_p1 = scmp.eq.s32.totalorder %s1260_s28, 0 }
   0x9   : > { %p186_p2 = scmp.lt.s32.totalorder %s1183_s24, 3  ;;  %s1185_s30 = smov [#allocation5]  }
   0xa   : > { %s199_s7 = sshll.u32 %s1185_s30, 4  ;;  %s214_s10 = sshll.u32 %s1454_s3, 4  ;;  %s200_s7 = int_to_ptr.vmem [resolvable:$true] %s199_s7  ;;  %s215_s10 = int_to_ptr.hbm [resolvable:$true] %s214_s10 }
   0xb   : > { %p1265_p3 = pnand %p830_p0, %p186_p2  ;;  %s231_s14 = sshll.u32 %s1456_s5, 4  ;;  %s232_s14 = int_to_ptr.hbm [resolvable:$true] %s231_s14 }
   0xc   : > { %s1186_s15 = smov [#allocation7]   ;;  %s1187_s17 = smov 64  }
   0xd   : > { %p897_p4 = pneg %p1265_p3  ;;  %s216_s16 = sshll.u32 %s1186_s15, 4  ;;  %s217_s16 = int_to_ptr.vmem [resolvable:$true] %s216_s16 }
   0xe   : > { %s1188_s18 = smov 4   ;;  %s1189_s19 = smov [#allocation8]  }
   0xf   : > { %p1277_p6 = pnand %p897_p4, %p45_p1  ;;  %s233_s20 = sshll.u32 %s1189_s19, 4  ;;  %s234_s20 = int_to_ptr.vmem [resolvable:$true] %s233_s20 }
  0x10   : > { %s829_s25 = sadd.s32 4294967294, %s1183_s24   ;;  %s1292_s26 = sadd.s32 1, %s1183_s24  }
  0x11   : > { %900 = dma.hbm_to_vmem [thread:$0]  (!%p1277_p6), %s198_s27, 256, %s200_s7, [#allocation6], %s1187_s17, %s1187_s17, %s1188_s18  }
  0x12   : > { %903 = dma.hbm_to_vmem [thread:$0]  (!%p1277_p6), %s215_s10, 256, %s217_s16, [#allocation6], %s1187_s17, %s1187_s17, %s1188_s18  }
  0x13   : > { %906 = dma.hbm_to_vmem [thread:$0]  (!%p1277_p6), %s232_s14, 256, %s234_s20, [#allocation9], %s1187_s17, %s1187_s17, %s1188_s18  }
  0x14   : > { %s31_s30 = sadd.s32 1, %s1179_s23  ;;  %s28_s27 = ssub.s32 %s1183_s24, %s1292_s26 }
  0x15   : > { %p38_p7 = scmp.ne.s32.totalorder %s1179_s23, %s1175_s22  ;;  %p29_p8 = scmp.eq.s32.totalorder %s28_s27, 0 }
  0x16   : > { %p39_p9 = scmp.eq.s32.totalorder %s1183_s24, 0  ;;  %p44_p10 = scmp.ne.s32.totalorder %s1175_s22, %s1171_s21 }
  0x17   : > { %p173_p11 = scmp.eq.s32.totalorder %s1260_s28, 1  ;;  %p179_p0 = scmp.eq.s32.totalorder %s829_s25, 1 }
  0x18   : > { %s1304_s7 = scalar_select %p29_p8, %s1179_s23, %s31_s30  }
  0x19   : > { %p1308_p12 = por %p45_p1, %p44_p10  ;;  %p1312_p13 = por %p173_p11, %p38_p7 }
  0x1a   : > { %p40_p2 = por %p39_p9, %p38_p7  ;;  %s247_s10 = sand.u32 1, %s1179_s23  }
  0x1b   : > { %p1317_p4 = por %p179_p0, %p44_p10  ;;  %p918_p6 = scmp.lt.s32.totalorder %s1183_s24, 2 }
  0x1c   : > { %s835_s12 = sshll.u32 %s247_s10, 2  ;;  %s836_s13 = sshll.u32 %s1183_s24, 2 }
  0x1d   : > { %s255_s16 = scalar_lea.hbm %s1451_s0, %s836_s13  ;;  %s251_s18 = scalar_lea.vmem [#allocation2], %s835_s12 }
  0x1e   : > { %s257_s17 = sshll.u32 %s255_s16, 4  ;;  %s259_s19 = sshll.u32 %s251_s18, 4  ;;  %s258_s17 = int_to_ptr.hbm [resolvable:$true] %s257_s17  ;;  %s260_s19 = int_to_ptr.vmem [resolvable:$true] %s259_s19 }
  0x1f   : > { %p1326_p8 = pnand %p918_p6, %p40_p2  ;;  %s248_s25 = scalar_lea.sflag [#allocation3], %s247_s10 }
  0x20   : > { %s1079_s30 = sshra.s32 %s258_s17, 4  ;;  %s1086_s12 = scalar_lea.hbm %s1451_s0, 8  ;;  %s1080_s30 = int_to_ptr.hbm [resolvable:$true] %s1079_s30 }
  0x21   : > { %s1081_s27 = scalar_lea.hbm %s1080_s30, 4  ;;  %p1083_p9 = pneg %p1326_p8 }
  0x22   : > { %p1082_p7 = scmp.ne.s32.totalorder %s1080_s30, %s1081_s27  ;;  %p1087_p0 = scmp.lt.s32.totalorder %s1080_s30, %s1451_s0 }
  0x23   : > { %p1088_p2 = scmp.lt.s32.totalorder %s1086_s12, %s1081_s27 }
  0x24   : > { %p1084_p10 = pnand %p1083_p9, %p1082_p7 }
  0x25   : > { %p1089_p6 = por %p1088_p2, %p1087_p0 }
  0x26   : > { %p1085_p11 = pneg %p1084_p10 }
  0x28   : > { %p1090_p5 = pnand %p1089_p6, %p1085_p11 }
  0x2a   : > { %1093 = shalt.err (!%p1090_p5)
}
  0x2b   : > { %910 = dma.hbm_to_vmem [thread:$0]  (!%p1326_p8), %s258_s17, 64, %s260_s19, %s248_s25  }
  0x2c   : > { %268 = sbr.rel (%p1265_p3) target bundleno = 1668 (0x684), region = 44  ;;  %s1343_s10 = sand.u32 (!%p1265_p3), 1, %s1175_s22  }
  0x2d   : > { %s838_s18 = sshll.u32 (!%p1265_p3), %s1343_s10, 2  ;;  %s271_s13 = scalar_lea.sflag (!%p1265_p3), [#allocation3], %s1343_s10 }
  0x2e   : > { %s274_s14 = scalar_lea.vmem (!%p1265_p3), [#allocation2], %s838_s18 }
  0x31   : > { %1154 = dma.done.wait (%p1308_p12), %s271_s13, 64  }
  0x32   : > { %1156 = vsyncadd (%p1308_p12), %s271_s13, 4294967232 }
  0x33   : > { %1158 = dma.done.wait (%p45_p1), [#allocation6], 512  }
  0x34   : > { %1160 = vsyncadd (%p45_p1), [#allocation6], 4294966784 }
  0x35   : > { %1162 = dma.done.wait (%p45_p1), [#allocation9], 256  }
  0x36   : > { %1164 = vsyncadd (%p45_p1), [#allocation9], 4294967040  ;;  %v878_v0 = vld [vmem:[#allocation5 + $0x8] sm:$0xff]  ;;  %v877_v1 = vld [vmem:[#allocation5] sm:$0xff]  ;;  %vm342_vm0 = vcmask 261120   ;;  %s1190_s17 = smov 120  }
  0x37   : > { %352 = vmatpush.bf16.msra.mxu0 %v878_v0  ;;  %v1359_v2 = vld [vmem:[%s274_s14] sm:$0xf]  ;;  %s1191_s19 = smov 64   ;;  %s1192_s20 = smov 96   ;;  %vm409_vm1 = vcmask 1043456   ;;  %vm374_vm2 = vcmask 64512  }
  0x38   : > { %v971_v3 = vld [vmem:[%s1453_s2] ss:$0 sm:$0xff]  ;;  %s1193_s25 = smov 88   ;;  %s1194_s30 = smov 80   ;;  %v360_v28 = vld [vmem:[#allocation7] sm:$0xf]  ;;  %v321_v45 = vunpack.c.l.bf16 %v1359_v2 }
  0x39   : > { %s1195_s27 = smov 56   ;;  %s1196_s12 = smov 72   ;;  %v433_v29 = vsel %vm409_vm1, %v360_v28, 0  ;;  %v361_v30 = vld [vmem:[#allocation7 + $0x4] sm:$0xf] }
  0x3a   : > { %442 = vmatpush.bf16.msra.mxu3 %v433_v29  ;;  %v510_v31 = vsel %vm409_vm1, %v361_v30, 0  ;;  %s1197_s15 = smov 112   ;;  %v972_v46 = vld [vmem:[%s1455_s4] ss:$0 sm:$0xff]  ;;  %s1198_s13 = smov 104  }
  0x3b   : > { %353 = vmatpush.bf16.msra.mxu0 %v877_v1  ;;  %v368_v48 = vadd.f32 %v972_v46, %v321_v45  ;;  %s1199_s14 = smov 48   ;;  %s1200_s29 = smov 40  }
  0x3c   : > { %s874_s8 = sshll.u32 %s1260_s28, 3 }
  0x3e   : > { %851 = vmatmul.msk.bf16.vlgmr.msra.gmra.mxu0 %vm342_vm0, %v1359_v2 }
  0x3f   : > { %519 = vmatpush.bf16.msrb.mxu0 %v510_v31 }
  0xbb   : > { %v355_v4 = vpop.f32.mrf.mxu0 }
  0xbc   : > { %v356_v5 = vadd.f32 %v971_v3, %v355_v4 }
  0xbe   : > { %v359_v6 = vpack.c.bf16 %v356_v5, %v356_v5 }
  0xc0   : > { %v370_v7 = vunpack.c.l.b16 %v359_v6 }
  0xc2   : > { %v1366_v8 = vpack.c.b16 %v370_v7, %v370_v7 }
  0xc3   : > { %v357_v9 = vpop.f32.mrf.mxu0 }
  0xc4   : > { %449 = vrot.lane.b32.xlu2 %v1366_v8, %s1190_s17  ;;  %404 = vrot.lane.b32.xlu1 %v1366_v8, %s1191_s19  ;;  %s842_s17 = sshll.u32 %s1343_s10, 3 }
  0xc5   : > { %372 = vrot.lane.b32.xlu0 %v1366_v8, %s1192_s20 }
  0xcc   : > { %451 = vrot.lane.b32.xlu1 %v1366_v8, %s1193_s25  ;;  %s725_s25 = scalar_lea.hbm %s1457_s6, %s874_s8 }
 0x11e   : > { %v450_v27 = vpop.permute.xlu2 %449 }
 0x136   : > { %v405_v10 = vpop.permute.xlu1 %404 }
 0x137   : > { %v373_v11 = vpop.permute.xlu0 %372  ;;  %v411_v12 = vsel %vm409_vm1, %v405_v10, 0 }
 0x138   : > { %v379_v13 = vsel %vm374_vm2, %v373_v11, 0  ;;  %420 = vmatpush.bf16.msra.mxu2 %v411_v12 }
 0x139   : > { %388 = vmatpush.bf16.xpose.msra.mxu1 %v379_v13 }
 0x13e   : > { %v452_v14 = vpop.permute.xlu1 %451 }
 0x13f   : > { %v457_v15 = vsel %vm374_vm2, %v452_v14, 0 }
 0x140   : > { %852 = vmatmul.msk.bf16.vlgmr.msra.gmra.mxu1 %vm374_vm2, %v359_v6  ;;  %466 = vmatpush.bf16.xpose.msrb.mxu2 %v457_v15 }
 0x1bd   : > { %v390_v16 = vpop.f32.mrf.mxu1 }
 0x1be   : > { %v394_v17 = vsel %vm374_vm2, %v390_v16, -inf }
 0x1bf   : > { %395 = vmax.xlane.f32.xlu0 %v394_v17 }
 0x1c5   : > { %v392_v18 = vpop.f32.mrf.mxu1 }
 0x1d3   : > { %528 = vrot.lane.b32.xlu0 %v1366_v8, %s1194_s30  ;;  %s318_s30 = scalar_lea.vmem [#allocation10], %s842_s17 }
 0x232   : > { %v396_v19 = vpop.xlane.xlu0 %395 }
 0x233   : > { %v397_v20 = vsub.f32 %v390_v16, %v396_v19 }
 0x235   : > { %v398_v21 = vmul.f32 1.442695, %v397_v20  ;;  %v362_v20 = vld [vmem:[#allocation7 + $0x8] sm:$0xf] }
 0x237   : > { %973 = vpow2.f32 %v398_v21  ;;  %v587_v21 = vsel %vm409_vm1, %v362_v20, 0 }
 0x23d   : > { %v974_v22 = vpop.eup %973 }
 0x23e   : > { %v400_v23 = vsel %vm374_vm2, %v974_v22, 0.0  ;;  %v403_v24 = vpack.c.bf16 %v974_v22, %v974_v22  ;;  %v363_v22 = vld [vmem:[#allocation7 + $0xc] sm:$0xf] }
 0x23f   : > { %401 = vadd.xlane.f32.xlu2 %v400_v23  ;;  %v664_v23 = vsel %vm409_vm1, %v363_v22, 0 }
 0x240   : > { %853 = vmatmul.msk.bf16.vlgmr.msra.gmra.mxu2 %vm374_vm2, %v403_v24 }
 0x245   : > { %v529_v25 = vpop.permute.xlu0 %528 }
 0x246   : > { %v534_v26 = vsel %vm374_vm2, %v529_v25, 0 }
 0x247   : > { %543 = vmatpush.bf16.xpose.msrb.mxu1 %v534_v26 }
 0x250   : > { %855 = vmatmul.msk.bf16.vlgmr.msrb.gmra.mxu2 %vm374_vm2, %v450_v27 }
 0x257   : > { %482 = vrot.lane.b32.xlu2 %v1366_v8, %s1195_s27  ;;  %s727_s27 = sshll.u32 %s318_s30, 4  ;;  %s728_s27 = int_to_ptr.vmem [resolvable:$true] %s727_s27 }
 0x25f   : > { %605 = vrot.lane.b32.xlu2 %v1366_v8, %s1196_s12  ;;  %s729_s12 = sshll.u32 %s725_s25, 4  ;;  %s730_s12 = int_to_ptr.hbm [resolvable:$true] %s729_s12 }
 0x260   : > { %s1123_s16 = sshra.s32 %s730_s12, 4  ;;  %s1124_s16 = int_to_ptr.hbm [resolvable:$true] %s1123_s16 }
 0x261   : > { %s1125_s18 = scalar_lea.hbm %s1124_s16, 8  ;;  %p1130_p12 = scmp.lt.s32.totalorder %s1124_s16, %s1457_s6 }
 0x262   : > { %p1126_p1 = scmp.ne.s32.totalorder %s1124_s16, %s1125_s18 }
 0x264   : > { %p1127_p3 = pnand %p1126_p1, %p1312_p13 }
 0x266   : > { %p1128_p5 = pneg %p1127_p3 }
 0x2b2   : > { %v402_v32 = vpop.xlane.xlu2 %401 }
 0x2b3   : > { %975 = vrcp.f32 %v402_v32 }
 0x2b9   : > { %v976_v36 = vpop.eup %975 }
 0x2ba   : > { %v483_v33 = vpop.permute.xlu2 %482 }
 0x2bb   : > { %v488_v34 = vsel %vm409_vm1, %v483_v33, 0 }
 0x2bc   : > { %497 = vmatpush.bf16.msrb.mxu3 %v488_v34 }
 0x2c2   : > { %v606_v35 = vpop.permute.xlu2 %605 }
 0x2c3   : > { %v611_v37 = vsel %vm374_vm2, %v606_v35, 0  ;;  %v422_v38 = vpop.f32.mrf.mxu2 }
 0x2c4   : > { %v427_v39 = vmul.f32 %v976_v36, %v422_v38  ;;  %620 = vmatpush.bf16.xpose.msra.mxu0 %v611_v37  ;;  %v880_v36 = vld [vmem:[#allocation8 + $0x8] sm:$0xff]  ;;  %v879_v37 = vld [vmem:[#allocation8] sm:$0xff] }
 0x2c6   : > { %v428_v40 = vpack.c.bf16 %v427_v39, %v427_v39 }
 0x2c8   : > { %854 = vmatmul.msk.bf16.vlgmr.msra.gmra.mxu3 %vm374_vm2, %v428_v40 }
 0x2c9   : > { %596 = vmatpush.bf16.msra.mxu3 %v587_v21 }
 0x2cb   : > { %v424_v41 = vpop.f32.mrf.mxu2 }
 0x2d3   : > { %v468_v42 = vpop.f32.mrf.mxu2 }
 0x2d4   : > { %v472_v43 = vsel %vm374_vm2, %v468_v42, -inf }
 0x2d5   : > { %473 = vmax.xlane.f32.xlu1 %v472_v43 }
 0x2db   : > { %v470_v44 = vpop.f32.mrf.mxu2 }
 0x2ee   : > { %526 = vrot.lane.b32.xlu1 %v1366_v8, %s1197_s15  ;;  %s715_s15 = scalar_lea.sflag [#allocation4], %s1343_s10 }
 0x348   : > { %v474_v47 = vpop.xlane.xlu1 %473 }
 0x349   : > { %v475_v49 = vsub.f32 %v468_v42, %v474_v47 }
 0x34b   : > { %v476_v50 = vmul.f32 1.442695, %v475_v49  ;;  %v444_v51 = vpop.f32.mrf.mxu3 }
 0x34c   : > { %v448_v52 = vadd.f32 %v444_v51, %v368_v48 }
 0x34d   : > { %977 = vpow2.f32 %v476_v50 }
 0x353   : > { %v978_v53 = vpop.eup %977  ;;  %v446_v54 = vpop.f32.mrf.mxu3 }
 0x354   : > { %v478_v55 = vsel %vm374_vm2, %v978_v53, 0.0  ;;  %v481_v56 = vpack.c.bf16 %v978_v53, %v978_v53 }
 0x355   : > { %479 = vadd.xlane.f32.xlu0 %v478_v55 }
 0x356   : > { %856 = vmatmul.msk.bf16.vlgmr.msrb.gmra.mxu3 %vm374_vm2, %v481_v56 }
 0x357   : > { %706 = vmatpush.bf16.msrb.mxu3 %v880_v36 }
 0x35b   : > { %707 = vmatpush.bf16.msrb.mxu3 %v879_v37 }
 0x360   : > { %v527_v57 = vpop.permute.xlu1 %526 }
 0x361   : > { %858 = vmatmul.msk.bf16.vlgmr.msrb.gmra.mxu1 %vm374_vm2, %v527_v57 }
 0x369   : > { %603 = vrot.lane.b32.xlu0 %v1366_v8, %s1198_s13 }
 0x371   : > { %559 = vrot.lane.b32.xlu0 %v1366_v8, %s1199_s14  ;;  %s1129_s14 = scalar_lea.hbm %s1457_s6, 16 }
 0x372   : > { %p1131_p8 = scmp.lt.s32.totalorder %s1129_s14, %s1125_s18 }
 0x374   : > { %p1132_p7 = por %p1131_p8, %p1130_p12 }
 0x376   : > { %p1133_p9 = pnand %p1132_p7, %p1128_p5 }
 0x379   : > { %636 = vrot.lane.b32.xlu0 %v1366_v8, %s1200_s29 }
 0x3c8   : > { %v480_v58 = vpop.xlane.xlu0 %479 }
 0x3c9   : > { %979 = vrcp.f32 %v480_v58 }
 0x3cf   : > { %v980_v59 = vpop.eup %979 }
 0x3d9   : > { %v499_v60 = vpop.f32.mrf.mxu3 }
 0x3da   : > { %v504_v61 = vmul.f32 %v980_v59, %v499_v60 }
 0x3db   : > { %v604_v62 = vpop.permute.xlu0 %603 }
 0x3dc   : > { %v505_v63 = vpack.c.bf16 %v504_v61, %v504_v61 }
 0x3de   : > { %857 = vmatmul.msk.bf16.vlgmr.msrb.gmra.mxu0 %vm374_vm2, %v505_v63  ;;  %v545_v0 = vpop.f32.mrf.mxu1 }
 0x3df   : > { %v549_v1 = vsel %vm374_vm2, %v545_v0, -inf }
 0x3e0   : > { %550 = vmax.xlane.f32.xlu2 %v549_v1 }
 0x3e1   : > { %v501_v2 = vpop.f32.mrf.mxu3 }
 0x3e3   : > { %v560_v3 = vpop.permute.xlu0 %559 }
 0x3e4   : > { %v565_v4 = vsel %vm409_vm1, %v560_v3, 0 }
 0x3e5   : > { %574 = vmatpush.bf16.msra.mxu2 %v565_v4 }
 0x3e6   : > { %v547_v5 = vpop.f32.mrf.mxu1 }
 0x3e9   : > { %673 = vmatpush.bf16.msrb.mxu2 %v664_v23 }
 0x3eb   : > { %v637_v6 = vpop.permute.xlu0 %636 }
 0x3ec   : > { %v642_v7 = vsel %vm409_vm1, %v637_v6, 0 }
 0x3ed   : > { %651 = vmatpush.bf16.msra.mxu1 %v642_v7 }
 0x3ee   : > { %861 = vmatmul.msk.bf16.vlgmr.msra.gmra.mxu0 %vm374_vm2, %v604_v62 }
 0x453   : > { %v551_v8 = vpop.xlane.xlu2 %550 }
 0x454   : > { %v552_v9 = vsub.f32 %v545_v0, %v551_v8 }
 0x456   : > { %v553_v10 = vmul.f32 1.442695, %v552_v9 }
 0x458   : > { %981 = vpow2.f32 %v553_v10 }
 0x45b   : > { %v521_v11 = vpop.f32.mrf.mxu0 }
 0x45c   : > { %v525_v12 = vadd.f32 %v521_v11, %v448_v52 }
 0x45e   : > { %v982_v13 = vpop.eup %981 }
 0x45f   : > { %v558_v14 = vpack.c.bf16 %v982_v13, %v982_v13  ;;  %v555_v15 = vsel %vm374_vm2, %v982_v13, 0.0 }
 0x460   : > { %556 = vadd.xlane.f32.xlu0 %v555_v15 }
 0x461   : > { %859 = vmatmul.msk.bf16.vlgmr.msra.gmra.mxu2 %vm374_vm2, %v558_v14 }
 0x463   : > { %v523_v16 = vpop.f32.mrf.mxu0 }
 0x46b   : > { %v622_v17 = vpop.f32.mrf.mxu0 }
 0x46c   : > { %v626_v18 = vsel %vm374_vm2, %v622_v17, -inf }
 0x46d   : > { %627 = vmax.xlane.f32.xlu1 %v626_v18 }
 0x473   : > { %v624_v19 = vpop.f32.mrf.mxu0 }
 0x4d3   : > { %v557_v24 = vpop.xlane.xlu0 %556 }
 0x4d4   : > { %983 = vrcp.f32 %v557_v24 }
 0x4da   : > { %v984_v28 = vpop.eup %983 }
 0x4e0   : > { %v628_v25 = vpop.xlane.xlu1 %627 }
 0x4e1   : > { %v629_v26 = vsub.f32 %v622_v17, %v628_v25 }
 0x4e3   : > { %v630_v27 = vmul.f32 1.442695, %v629_v26 }
 0x4e4   : > { %v576_v29 = vpop.f32.mrf.mxu2 }
 0x4e5   : > { %985 = vpow2.f32 %v630_v27  ;;  %v581_v30 = vmul.f32 %v984_v28, %v576_v29 }
 0x4e7   : > { %v582_v31 = vpack.c.bf16 %v581_v30, %v581_v30 }
 0x4e9   : > { %860 = vmatmul.msk.bf16.vlgmr.msra.gmra.mxu3 %vm374_vm2, %v582_v31 }
 0x4eb   : > { %v986_v32 = vpop.eup %985 }
 0x4ec   : > { %v635_v33 = vpack.c.bf16 %v986_v32, %v986_v32  ;;  %v578_v34 = vpop.f32.mrf.mxu2  ;;  %v632_v35 = vsel %vm374_vm2, %v986_v32, 0.0 }
 0x4ed   : > { %633 = vadd.xlane.f32.xlu2 %v632_v35 }
 0x4ee   : > { %862 = vmatmul.msk.bf16.vlgmr.msra.gmra.mxu1 %vm374_vm2, %v635_v33 }
 0x560   : > { %v634_v38 = vpop.xlane.xlu2 %633 }
 0x561   : > { %987 = vrcp.f32 %v634_v38 }
 0x567   : > { %v988_v39 = vpop.eup %987 }
 0x56b   : > { %v653_v40 = vpop.f32.mrf.mxu1 }
 0x56c   : > { %v658_v41 = vmul.f32 %v988_v39, %v653_v40  ;;  %v598_v42 = vpop.f32.mrf.mxu3 }
 0x56d   : > { %v602_v43 = vadd.f32 %v598_v42, %v525_v12 }
 0x56e   : > { %v659_v44 = vpack.c.bf16 %v658_v41, %v658_v41 }
 0x570   : > { %863 = vmatmul.msk.bf16.vlgmr.msrb.gmra.mxu2 %vm374_vm2, %v659_v44 }
 0x573   : > { %v655_v45 = vpop.f32.mrf.mxu1 }
 0x574   : > { %v600_v46 = vpop.f32.mrf.mxu3 }
 0x5f3   : > { %v675_v47 = vpop.f32.mrf.mxu2 }
 0x5f4   : > { %v679_v48 = vadd.f32 %v675_v47, %v602_v43 }
 0x5f6   : > { %v680_v49 = vpack.c.bf16 %v679_v48, %v679_v48 }
 0x5f8   : > { %872 = vmatmul.msk.bf16.vlgmr.msrb.gmra.mxu3 %vm342_vm0, %v680_v49 }
 0x5fb   : > { %v677_v50 = vpop.f32.mrf.mxu2 }
 0x67b   : > { %v709_v51 = vpop.f32.mrf.mxu3 }
 0x67c   : > { %v710_v52 = vadd.f32 %v709_v51, %v679_v48 }
 0x67e   : > { %713 = vst.msk [vmem:[%s318_s30] sm:$0xff] %vm342_vm0, %v710_v52 }
 0x67f   : > { %1136 = shalt.err (!%p1133_p9)
}
 0x680   : > { %895 = dma.vmem_to_hbm [thread:$0]  (%p1312_p13), %s728_s27, 128, %s730_s12, %s715_s15  }
 0x683   : > { %v711_v53 = vpop.f32.mrf.mxu3 }
 0x684 PF: > { %s741_s10 = sand.u32 1, %s1171_s21   ;;  %p1464_p10 = scmp.ge.s32.totalorder %s1183_s24, 2 }
 0x685   : > { %s742_s17 = scalar_lea.sflag [#allocation4], %s741_s10 }
 0x686   : > { %p912_p11 = pnand %p1464_p10, %p1317_p4 }
 0x688   : > { %p913_p0 = pneg %p912_p11 }
 0x68a   : > { %1166 = dma.done.wait (%p913_p0), %s742_s17, 128  }
 0x68b   : > { %1168 = vsyncadd (%p913_p0), %s742_s17, 4294967168  ;;  %p21_p2 = scmp.ge.s32.totalorder %s1292_s26, 4   ;;  %s1465_s21 = smov %s1175_s22 }
 0x68c   : > { %s1466_s22 = smov %s1179_s23  ;;  %s1467_s23 = smov %s1304_s7 }
 0x68d   : > { %s1468_s24 = smov %s1292_s26  ;;  %23 = sbr.rel (!%p21_p2) target bundleno = 7 (0x7), region = 101 }
 0x692   :  { %748 = vsyncpa [#allocation3], 1 }
 0x693   :  { %750 = vsyncpa [#allocation3 + $0x1], 1 }
 0x694   :  { %751 = vsyncpa [#allocation6], 1 }
 0x695   :  { %752 = vsyncpa [#allocation9], 1 }
 0x696   :  { %753 = vsyncpa [#allocation4], 1 }
 0x697   :  { %755 = vsyncpa [#allocation4 + $0x1], 1 }

</bundles_post_ra>
